<compile_context>
chip_gen: v7x
topology: tpu7x:2x2x1
jax: 0.10.0
libtpu: 0.0.40
codegen_flags: <defaults>
</compile_context>

<pallas_src>
import jax
import jax.numpy as jnp
from jax import lax
from jax.experimental import pallas as pl
from jax.experimental.pallas import tpu as pltpu


def _round_up(x: int, m: int) -> int:
    return ((x + m - 1) // m) * m


def _cdiv(a: int, b: int) -> int:
    return -(-a // b)


def fffnn_fused_kernel(x_ref, w0_ref, b0_ref, wr_ref, br_ref, o_ref):
    # x_ref : (Bt, In_pad) f32
    # w0_ref: (In_pad, H_pad) bf16      b0_ref: (1, H_pad) f32
    # wr_ref: (Lr, H_pad, H_pad) bf16   br_ref: (Lr, 1, H_pad) f32
    # o_ref : (Bt, H_pad) f32

    def ff_layer(h, w, b):
        # L2 normalize over the feature axis (padded zero cols contribute 0).
        norm = jnp.sqrt(jnp.sum(h * h, axis=1, keepdims=True))            # (Bt,1)
        h_n = h * pl.reciprocal(norm + 1e-8, approx=False)                # exact
        # Linear on the MXU: bf16 operands, f32 accumulation.
        y = jnp.dot(h_n.astype(jnp.bfloat16), w,
                    preferred_element_type=jnp.float32)                   # (Bt,H_pad)
        return jnp.maximum(y + b.astype(jnp.float32), 0.0)                # bias+ReLU

    x = x_ref[...].astype(jnp.float32)
    x = ff_layer(x, w0_ref[...], b0_ref[...])          # layer 0: (Bt, In_pad)->(Bt, H_pad)

    n_rest = wr_ref.shape[0]
    if n_rest <= 8:
        # Small, fixed layer count -> static unroll (full LLO visibility).
        for l in range(n_rest):
            x = ff_layer(x, wr_ref[l], br_ref[l])
    else:
        # Deep stacks: real loop keeps live ranges / vreg pressure bounded.
        x = lax.fori_loop(0, n_rest,
                          lambda l, h: ff_layer(h, wr_ref[l], br_ref[l]), x)

    o_ref[...] = x.astype(o_ref.dtype)


def init_fffnn_params(key, in_features, hidden_layers, hidden_units):
    """nn.Linear-style init (uniform +-1/sqrt(fan_in)), non-square zero padding.

    Returns:
      w0     : (In_pad, H_pad) bf16  -- layer 0 weight (stored transposed: x @ w0)
      b0     : (1, H_pad)      f32
      w_rest : (L-1, H_pad, H_pad) bf16
      b_rest : (L-1, 1, H_pad) f32
    """
    assert hidden_layers >= 2, "fused kernel expects >= 2 layers (module default is 4)"
    in_pad = _round_up(in_features, 128)
    h_pad = _round_up(hidden_units, 128)

    key, kw, kb = jax.random.split(key, 3)
    bound = 1.0 / (in_features ** 0.5)
    w0 = jax.random.uniform(kw, (in_features, hidden_units), jnp.float32, -bound, bound)
    b0 = jax.random.uniform(kb, (hidden_units,), jnp.float32, -bound, bound)
    w0_pad = jnp.zeros((in_pad, h_pad), jnp.float32).at[:in_features, :hidden_units].set(w0)
    b0_pad = jnp.zeros((1, h_pad), jnp.float32).at[0, :hidden_units].set(b0)

    ws, bs = [], []
    for _ in range(hidden_layers - 1):
        key, kw, kb = jax.random.split(key, 3)
        bound = 1.0 / (hidden_units ** 0.5)
        w = jax.random.uniform(kw, (hidden_units, hidden_units), jnp.float32, -bound, bound)
        b = jax.random.uniform(kb, (hidden_units,), jnp.float32, -bound, bound)
        ws.append(jnp.zeros((h_pad, h_pad), jnp.float32)
                  .at[:hidden_units, :hidden_units].set(w))
        bs.append(jnp.zeros((1, h_pad), jnp.float32).at[0, :hidden_units].set(b))

    return (w0_pad.astype(jnp.bfloat16), b0_pad,
            jnp.stack(ws).astype(jnp.bfloat16), jnp.stack(bs))


def fffnn_forward(x, w0, b0, w_rest, b_rest, hidden_units, *, max_batch_tile=1024):
    """Fused forward pass of all layers. x: (B, in_features) f32."""
    orig_b, fin = x.shape
    in_pad, h_pad = w0.shape
    n_rest = w_rest.shape[0]

    # Zero-pad input features to the lane-dense padded width (exact).
    if fin < in_pad:
        x = jnp.pad(x, ((0, 0), (0, in_pad - fin)))

    # ---- generation-aware VMEM budget & batch-tile selection ----
    try:
        vmem_cap = int(getattr(pltpu.get_tpu_info(), "vmem_capacity_bytes", 64 << 20))
    except Exception:
        vmem_cap = 64 << 20                       # conservative: v7x per-core VMEM
    budget = (vmem_cap * 3) // 4                  # leave headroom for compiler scratch

    w_bytes = (in_pad * h_pad + n_rest * h_pad * h_pad) * 2   # bf16, single-buffered
    b_bytes = (1 + n_rest) * h_pad * 4
    # per-row cost: double-buffered in/out tiles + ~4 activation-sized temporaries
    per_row = 2 * in_pad * 4 + 2 * h_pad * 4 + 4 * h_pad * 4

    avail = max(budget - (w_bytes + b_bytes), 1 << 20)
    tile_cap = max(8, min(max_batch_tile, ((avail // per_row) // 8) * 8))

    # Step count: bound batch-padding waste and, when the batch allows it,
    # use >= 2 steps so the "parallel" axis shards across v7x's two TCs.
    n_steps = _cdiv(orig_b, tile_cap)
    if orig_b >= 16:
        n_steps = max(n_steps, 2)
    tile = _round_up(_cdiv(orig_b, n_steps), 8)
    padded_b = tile * n_steps
    if padded_b != orig_b:
        # Zero rows are harmless (sliced off at the end).
        x = jnp.pad(x, ((0, padded_b - orig_b), (0, 0)))

    vmem_limit = (w_bytes + b_bytes
                  + 2 * tile * (in_pad + h_pad) * 4          # double-buffered I/O tiles
                  + 4 * tile * h_pad * 4                     # compute headroom
                  + (2 << 20))                               # slack
    vmem_limit = int(min(max(vmem_limit, 32 << 20), budget))

    out = pl.pallas_call(
        fffnn_fused_kernel,
        out_shape=jax.ShapeDtypeStruct((padded_b, h_pad), x.dtype),
        grid=(n_steps,),
        in_specs=[
            pl.BlockSpec((tile, in_pad), lambda i: (i, 0)),
            # Grid-invariant operands: constant index_map + single buffer.
            pl.BlockSpec((in_pad, h_pad), lambda i: (0, 0),
                         pipeline_mode=pl.Buffered(1)),
            pl.BlockSpec((1, h_pad), lambda i: (0, 0),
                         pipeline_mode=pl.Buffered(1)),
            pl.BlockSpec((n_rest, h_pad, h_pad), lambda i: (0, 0, 0),
                         pipeline_mode=pl.Buffered(1)),
            pl.BlockSpec((n_rest, 1, h_pad), lambda i: (0, 0, 0),
                         pipeline_mode=pl.Buffered(1)),
        ],
        out_specs=pl.BlockSpec((tile, h_pad), lambda i: (i, 0)),
        compiler_params=pltpu.CompilerParams(
            dimension_semantics=("parallel",),
            vmem_limit_bytes=vmem_limit),
    )(x, w0, b0, w_rest, b_rest)

    return out[:orig_b, :hidden_units]


def fffnn_reference(x, w0, b0, w_rest, b_rest, in_features, hidden_units):
    """Pure-JAX f32 reference mirroring the PyTorch module."""
    ws = [w0.astype(jnp.float32)[:in_features, :hidden_units]]
    bs = [b0[0, :hidden_units]]
    for l in range(w_rest.shape[0]):
        ws.append(w_rest[l].astype(jnp.float32)[:hidden_units, :hidden_units])
        bs.append(b_rest[l, 0, :hidden_units])
    h = x
    for w, b in zip(ws, bs):
        norm = jnp.sqrt(jnp.sum(h * h, axis=1, keepdims=True))
        h = h / (norm + 1e-8)
        h = jnp.maximum(h @ w + b, 0.0)
    return h


if __name__ == "__main__":
    # Small shapes consistent with the module (flat feature vectors per sample).
    BATCH = 16
    IN_FEATURES = 32
    HIDDEN_LAYERS = 4
    HIDDEN_UNITS = 256

    key = jax.random.PRNGKey(0)
    key, kx = jax.random.split(key)
    x = jax.random.normal(kx, (BATCH, IN_FEATURES), jnp.float32)

    w0, b0, w_rest, b_rest = init_fffnn_params(key, IN_FEATURES, HIDDEN_LAYERS,
                                               HIDDEN_UNITS)

    out = fffnn_forward(x, w0, b0, w_rest, b_rest, HIDDEN_UNITS)
    out = jax.block_until_ready(out)

    assert out.shape == (BATCH, HIDDEN_UNITS)
    assert bool(jnp.all(jnp.isfinite(out)))
    assert bool(jnp.all(out >= 0.0))  # ReLU output is non-negative

    # Loose-ish tolerance: kernel uses bf16 MXU operands (f32 accumulation).
    ref = fffnn_reference(x, w0, b0, w_rest, b_rest, IN_FEATURES, HIDDEN_UNITS)
    max_err = float(jnp.max(jnp.abs(out - ref)))
    assert max_err < 2e-2, max_err

    print("KERNEL_OK")
</pallas_src>

<mosaic_0001>
module attributes {stable_mosaic.version = 11 : i64} {
  func.func @fffnn_fused_kernel(%arg0: i32, %arg1: memref<8x128xf32, #tpu.memory_space<vmem>>, %arg2: memref<128x256xbf16, #tpu.memory_space<vmem>>, %arg3: memref<1x256xf32, #tpu.memory_space<vmem>>, %arg4: memref<3x256x256xbf16, #tpu.memory_space<vmem>>, %arg5: memref<3x1x256xf32, #tpu.memory_space<vmem>>, %arg6: memref<8x256xf32, #tpu.memory_space<vmem>>) attributes {dimension_semantics = [#tpu.dimension_semantics<parallel>], iteration_bounds = array<i64: 2>, scalar_prefetch = 0 : i64, scratch_operands = 0 : i64, tpu.core_type = #tpu.core_type<tc>, window_params = [{transform_indices = @transform_0, window_bounds = array<i64: 8, 128>}, {pipeline_mode = #tpu.pipeline_mode<synchronous>, transform_indices = @transform_1, window_bounds = array<i64: 128, 256>}, {pipeline_mode = #tpu.pipeline_mode<synchronous>, transform_indices = @transform_2, window_bounds = array<i64: 1, 256>}, {pipeline_mode = #tpu.pipeline_mode<synchronous>, transform_indices = @transform_3, window_bounds = array<i64: 3, 256, 256>}, {pipeline_mode = #tpu.pipeline_mode<synchronous>, transform_indices = @transform_4, window_bounds = array<i64: 3, 1, 256>}, {transform_indices = @transform_5, window_bounds = array<i64: 8, 256>}]} {
    %c0 = arith.constant 0 : index
    %c0_0 = arith.constant 0 : index
    %0 = vector.load %arg1[%c0, %c0_0] : memref<8x128xf32, #tpu.memory_space<vmem>>, vector<8x128xf32>
    %c0_1 = arith.constant 0 : index
    %c0_2 = arith.constant 0 : index
    %1 = vector.load %arg2[%c0_1, %c0_2] : memref<128x256xbf16, #tpu.memory_space<vmem>>, vector<128x256xbf16>
    %c0_3 = arith.constant 0 : index
    %c0_4 = arith.constant 0 : index
    %2 = vector.load %arg3[%c0_3, %c0_4] : memref<1x256xf32, #tpu.memory_space<vmem>>, vector<1x256xf32>
    %3 = arith.mulf %0, %0 : vector<8x128xf32>
    %cst = arith.constant dense<0.000000e+00> : vector<8xf32>
    %4 = vector.multi_reduction <add>, %3, %cst [1] : vector<8x128xf32> to vector<8xf32>
    %5 = vector.shape_cast %4 : vector<8xf32> to vector<8x1xf32>
    %6 = math.sqrt %5 : vector<8x1xf32>
    %cst_5 = arith.constant 9.99999993E-9 : f32
    %7 = vector.broadcast %cst_5 : f32 to vector<8x1xf32>
    %8 = arith.addf %6, %7 : vector<8x1xf32>
    %9 = tpu.reciprocal %8 : vector<8x1xf32> -> vector<8x1xf32>
    %10 = vector.broadcast %9 : vector<8x1xf32> to vector<8x128xf32>
    %11 = arith.mulf %0, %10 : vector<8x128xf32>
    %12 = arith.truncf %11 : vector<8x128xf32> to vector<8x128xbf16>
    %cst_6 = arith.constant dense<0.000000e+00> : vector<8x256xf32>
    %13 = tpu.matmul %12, %1, %cst_6 {dimension_numbers = #tpu.dot_dimension_numbers<[1], [0], [0], [1], [0, 0, 1, 1], [], []>} : vector<8x128xbf16>, vector<128x256xbf16>, vector<8x256xf32> -> vector<8x256xf32>
    %14 = vector.broadcast %2 : vector<1x256xf32> to vector<8x256xf32>
    %15 = arith.addf %13, %14 : vector<8x256xf32>
    %cst_7 = arith.constant 0.000000e+00 : f32
    %16 = vector.broadcast %cst_7 : f32 to vector<8x256xf32>
    %17 = arith.maximumf %15, %16 : vector<8x256xf32>
    %c0_8 = arith.constant 0 : index
    %c0_9 = arith.constant 0 : index
    %c0_10 = arith.constant 0 : index
    %18 = vector.load %arg4[%c0_8, %c0_9, %c0_10] : memref<3x256x256xbf16, #tpu.memory_space<vmem>>, vector<1x256x256xbf16>
    %19 = vector.shape_cast %18 : vector<1x256x256xbf16> to vector<256x256xbf16>
    %c0_11 = arith.constant 0 : index
    %c0_12 = arith.constant 0 : index
    %c0_13 = arith.constant 0 : index
    %20 = vector.load %arg5[%c0_11, %c0_12, %c0_13] : memref<3x1x256xf32, #tpu.memory_space<vmem>>, vector<1x1x256xf32>
    %21 = vector.shape_cast %20 : vector<1x1x256xf32> to vector<1x256xf32>
    %22 = arith.mulf %17, %17 : vector<8x256xf32>
    %cst_14 = arith.constant dense<0.000000e+00> : vector<8xf32>
    %23 = vector.multi_reduction <add>, %22, %cst_14 [1] : vector<8x256xf32> to vector<8xf32>
    %24 = vector.shape_cast %23 : vector<8xf32> to vector<8x1xf32>
    %25 = math.sqrt %24 : vector<8x1xf32>
    %cst_15 = arith.constant 9.99999993E-9 : f32
    %26 = vector.broadcast %cst_15 : f32 to vector<8x1xf32>
    %27 = arith.addf %25, %26 : vector<8x1xf32>
    %28 = tpu.reciprocal %27 : vector<8x1xf32> -> vector<8x1xf32>
    %29 = vector.broadcast %28 : vector<8x1xf32> to vector<8x256xf32>
    %30 = arith.mulf %17, %29 : vector<8x256xf32>
    %31 = arith.truncf %30 : vector<8x256xf32> to vector<8x256xbf16>
    %cst_16 = arith.constant dense<0.000000e+00> : vector<8x256xf32>
    %32 = tpu.matmul %31, %19, %cst_16 {dimension_numbers = #tpu.dot_dimension_numbers<[1], [0], [0], [1], [0, 0, 1, 1], [], []>} : vector<8x256xbf16>, vector<256x256xbf16>, vector<8x256xf32> -> vector<8x256xf32>
    %33 = vector.broadcast %21 : vector<1x256xf32> to vector<8x256xf32>
    %34 = arith.addf %32, %33 : vector<8x256xf32>
    %cst_17 = arith.constant 0.000000e+00 : f32
    %35 = vector.broadcast %cst_17 : f32 to vector<8x256xf32>
    %36 = arith.maximumf %34, %35 : vector<8x256xf32>
    %c1 = arith.constant 1 : index
    %c0_18 = arith.constant 0 : index
    %c0_19 = arith.constant 0 : index
    %37 = vector.load %arg4[%c1, %c0_18, %c0_19] : memref<3x256x256xbf16, #tpu.memory_space<vmem>>, vector<1x256x256xbf16>
    %38 = vector.shape_cast %37 : vector<1x256x256xbf16> to vector<256x256xbf16>
    %c1_20 = arith.constant 1 : index
    %c0_21 = arith.constant 0 : index
    %c0_22 = arith.constant 0 : index
    %39 = vector.load %arg5[%c1_20, %c0_21, %c0_22] : memref<3x1x256xf32, #tpu.memory_space<vmem>>, vector<1x1x256xf32>
    %40 = vector.shape_cast %39 : vector<1x1x256xf32> to vector<1x256xf32>
    %41 = arith.mulf %36, %36 : vector<8x256xf32>
    %cst_23 = arith.constant dense<0.000000e+00> : vector<8xf32>
    %42 = vector.multi_reduction <add>, %41, %cst_23 [1] : vector<8x256xf32> to vector<8xf32>
    %43 = vector.shape_cast %42 : vector<8xf32> to vector<8x1xf32>
    %44 = math.sqrt %43 : vector<8x1xf32>
    %cst_24 = arith.constant 9.99999993E-9 : f32
    %45 = vector.broadcast %cst_24 : f32 to vector<8x1xf32>
    %46 = arith.addf %44, %45 : vector<8x1xf32>
    %47 = tpu.reciprocal %46 : vector<8x1xf32> -> vector<8x1xf32>
    %48 = vector.broadcast %47 : vector<8x1xf32> to vector<8x256xf32>
    %49 = arith.mulf %36, %48 : vector<8x256xf32>
    %50 = arith.truncf %49 : vector<8x256xf32> to vector<8x256xbf16>
    %cst_25 = arith.constant dense<0.000000e+00> : vector<8x256xf32>
    %51 = tpu.matmul %50, %38, %cst_25 {dimension_numbers = #tpu.dot_dimension_numbers<[1], [0], [0], [1], [0, 0, 1, 1], [], []>} : vector<8x256xbf16>, vector<256x256xbf16>, vector<8x256xf32> -> vector<8x256xf32>
    %52 = vector.broadcast %40 : vector<1x256xf32> to vector<8x256xf32>
    %53 = arith.addf %51, %52 : vector<8x256xf32>
    %cst_26 = arith.constant 0.000000e+00 : f32
    %54 = vector.broadcast %cst_26 : f32 to vector<8x256xf32>
    %55 = arith.maximumf %53, %54 : vector<8x256xf32>
    %c2 = arith.constant 2 : index
    %c0_27 = arith.constant 0 : index
    %c0_28 = arith.constant 0 : index
    %56 = vector.load %arg4[%c2, %c0_27, %c0_28] : memref<3x256x256xbf16, #tpu.memory_space<vmem>>, vector<1x256x256xbf16>
    %57 = vector.shape_cast %56 : vector<1x256x256xbf16> to vector<256x256xbf16>
    %c2_29 = arith.constant 2 : index
    %c0_30 = arith.constant 0 : index
    %c0_31 = arith.constant 0 : index
    %58 = vector.load %arg5[%c2_29, %c0_30, %c0_31] : memref<3x1x256xf32, #tpu.memory_space<vmem>>, vector<1x1x256xf32>
    %59 = vector.shape_cast %58 : vector<1x1x256xf32> to vector<1x256xf32>
    %60 = arith.mulf %55, %55 : vector<8x256xf32>
    %cst_32 = arith.constant dense<0.000000e+00> : vector<8xf32>
    %61 = vector.multi_reduction <add>, %60, %cst_32 [1] : vector<8x256xf32> to vector<8xf32>
    %62 = vector.shape_cast %61 : vector<8xf32> to vector<8x1xf32>
    %63 = math.sqrt %62 : vector<8x1xf32>
    %cst_33 = arith.constant 9.99999993E-9 : f32
    %64 = vector.broadcast %cst_33 : f32 to vector<8x1xf32>
    %65 = arith.addf %63, %64 : vector<8x1xf32>
    %66 = tpu.reciprocal %65 : vector<8x1xf32> -> vector<8x1xf32>
    %67 = vector.broadcast %66 : vector<8x1xf32> to vector<8x256xf32>
    %68 = arith.mulf %55, %67 : vector<8x256xf32>
    %69 = arith.truncf %68 : vector<8x256xf32> to vector<8x256xbf16>
    %cst_34 = arith.constant dense<0.000000e+00> : vector<8x256xf32>
    %70 = tpu.matmul %69, %57, %cst_34 {dimension_numbers = #tpu.dot_dimension_numbers<[1], [0], [0], [1], [0, 0, 1, 1], [], []>} : vector<8x256xbf16>, vector<256x256xbf16>, vector<8x256xf32> -> vector<8x256xf32>
    %71 = vector.broadcast %59 : vector<1x256xf32> to vector<8x256xf32>
    %72 = arith.addf %70, %71 : vector<8x256xf32>
    %cst_35 = arith.constant 0.000000e+00 : f32
    %73 = vector.broadcast %cst_35 : f32 to vector<8x256xf32>
    %74 = arith.maximumf %72, %73 : vector<8x256xf32>
    %c0_36 = arith.constant 0 : index
    %c0_37 = arith.constant 0 : index
    %75 = vector.load %arg6[%c0_36, %c0_37] : memref<8x256xf32, #tpu.memory_space<vmem>>, vector<8x256xf32>
    tpu.vector_store %arg6[%c0_36, %c0_37], %74 {strides = array<i32>} : memref<8x256xf32, #tpu.memory_space<vmem>>, vector<8x256xf32>,
    return
  }
  func.func @transform_0(%arg0: i32) -> (i32, i32) {
    %c0_i32 = arith.constant 0 : i32
    %c0_i32_0 = arith.constant 0 : i32
    return %arg0, %c0_i32 : i32, i32
  }
  func.func @transform_1(%arg0: i32) -> (i32, i32) {
    %c0_i32 = arith.constant 0 : i32
    %c0_i32_0 = arith.constant 0 : i32
    %c0_i32_1 = arith.constant 0 : i32
    return %c0_i32, %c0_i32_0 : i32, i32
  }
  func.func @transform_2(%arg0: i32) -> (i32, i32) {
    %c0_i32 = arith.constant 0 : i32
    %c0_i32_0 = arith.constant 0 : i32
    %c0_i32_1 = arith.constant 0 : i32
    return %c0_i32, %c0_i32_0 : i32, i32
  }
  func.func @transform_3(%arg0: i32) -> (i32, i32, i32) {
    %c0_i32 = arith.constant 0 : i32
    %c0_i32_0 = arith.constant 0 : i32
    %c0_i32_1 = arith.constant 0 : i32
    %c0_i32_2 = arith.constant 0 : i32
    return %c0_i32, %c0_i32_0, %c0_i32_1 : i32, i32, i32
  }
  func.func @transform_4(%arg0: i32) -> (i32, i32, i32) {
    %c0_i32 = arith.constant 0 : i32
    %c0_i32_0 = arith.constant 0 : i32
    %c0_i32_1 = arith.constant 0 : i32
    %c0_i32_2 = arith.constant 0 : i32
    return %c0_i32, %c0_i32_0, %c0_i32_1 : i32, i32, i32
  }
  func.func @transform_5(%arg0: i32) -> (i32, i32) {
    %c0_i32 = arith.constant 0 : i32
    %c0_i32_0 = arith.constant 0 : i32
    return %arg0, %c0_i32 : i32, i32
  }
}

</mosaic_0001>

<bundles_post_ra>
// kernel: tpu_custom_call.1
= control target key start
LH: loop header
LB: loop body
LE: loop exit
PB: predicated region body
PF: predicated region fallthrough
CT: control target
= control target key end

     0   :  { %10 = vsyncpa [#allocation3], 0  ;;  %s2176_s0 = inlined_call_operand.hbm [shape: f32[16,128], index: 0, kind: input, shape index: {}]   ;;  %s2177_s1 = inlined_call_operand.hbm [shape: bf16[128,256], index: 1, kind: input, shape index: {}]   ;;  %s2178_s2 = inlined_call_operand.vmem [shape: f32[1,256], index: 2, kind: input, shape index: {}]   ;;  %s2179_s3 = inlined_call_operand.hbm [shape: bf16[3,256,256], index: 3, kind: input, shape index: {}]   ;;  %s2180_s4 = inlined_call_operand.vmem [shape: f32[3,1,256], index: 4, kind: input, shape index: {}]   ;;  %s2181_s5 = inlined_call_operand.hbm [shape: f32[16,256], index: 5, kind: output, shape index: {}]  }
   0x1   :  { %12 = vsyncpa [#allocation3 + $0x1], 0 }
   0x2   :  { %13 = vsyncpa [#allocation6], 0 }
   0x3   :  { %14 = vsyncpa [#allocation4], 0 }
   0x4   :  { %16 = vsyncpa [#allocation4 + $0x1], 0  ;;  %s1922_s18 = smov 0   ;;  %s1924_s19 = smov 0  }
   0x5   :  { %s1926_s20 = smov 0   ;;  %s1928_s21 = smov 0  }
   0x6 LB: > { %s1943_s22 = sadd.s32 4294967295, %s1883_s21   ;;  %s1341_s23 = sadd.s32 4294967294, %s1883_s21   ;;  %s1883_s21 = sphi %s1928_s21, %s2201_s21   ;;  %s1879_s20 = sphi %s1926_s20, %s2200_s20   ;;  %s1875_s19 = sphi %s1924_s19, %s2199_s19   ;;  %s1871_s18 = sphi %s1922_s18, %s2198_s18  }
   0x7   : > { %p42_p0 = scmp.ne.s32.totalorder %s1875_s19, %s1871_s18  ;;  %p2182_p1 = scmp.eq.s32.totalorder %s1943_s22, 0 }
   0x8   : > { %p156_p3 = scmp.eq.s32.totalorder %s1341_s23, 1  ;;  %p1342_p5 = scmp.ge.s32.totalorder %s1883_s21, 1 }
   0x9   : > { %p1952_p4 = por %p2182_p1, %p42_p0  ;;  %p163_p7 = scmp.lt.s32.totalorder %s1883_s21, 3 }
   0xa   : > { %p1957_p6 = por %p156_p3, %p42_p0  ;;  %s1885_s27 = smov [#allocation5]  }
   0xb   : > { %s2185_s24 = scalar_select %p1952_p4, 1, 0 }
   0xc   : > { %s2186_s25 = scalar_select %p1957_p6, 1, 0 }
   0xd   : > { %p1962_p8 = pnand %p1342_p5, %p163_p7  ;;  %s175_s28 = sshll.u32 %s1885_s27, 4  ;;  %s1966_s28 = int_to_ptr.vmem [resolvable:$true] %s175_s28 }
   0xe   : > { %s1886_s30 = smov [#allocation7]   ;;  %s1727_s9 = scalar_lea.hbm %s2177_s1, 2048 }
   0xf   : > { %p1485_p9 = pneg %p1962_p8  ;;  %s191_s6 = sshll.u32 %s1886_s30, 4  ;;  %s1977_s6 = int_to_ptr.vmem [resolvable:$true] %s191_s6 }
  0x10   : > { %p1728_p12 = scmp.ne.s32.totalorder %s2177_s1, %s1727_s9  ;;  %p1734_p5 = scmp.lt.u32.totalorder %s1727_s9, %s2177_s1 }
  0x11   : > { %p1973_p11 = pnand %p1485_p9, %p2182_p1 }
  0x13   : > { %p1729_p13 = pneg %p1973_p11 }
  0x15   : > { %p1730_p0 = pnand %p1729_p13, %p1728_p12 }
  0x17   : > { %p1731_p3 = pneg %p1730_p0 }
  0x19   : > { %p1736_p7 = pnand %p1734_p5, %p1731_p3 }
  0x1b   : > { %1739 = shalt.err (!%p1736_p7)
}
  0x1c   : > { %s1740_s14 = scalar_lea.vmem %s1966_s28, 2048  ;;  %p1748_p2 = scmp.lt.s32.totalorder %s1966_s28, %s1966_s28 }
  0x1d   : > { %p1741_p9 = scmp.ne.s32.totalorder %s1966_s28, %s1740_s14  ;;  %p1749_p12 = scmp.lt.s32.totalorder %s1740_s14, %s1740_s14 }
  0x1f   : > { %p1743_p10 = pnand %p1741_p9, %p1729_p13  ;;  %p1750_p0 = por %p1749_p12, %p1748_p2 }
  0x21   : > { %p1744_p1 = pneg %p1743_p10 }
  0x23   : > { %p1751_p6 = pnand %p1750_p0, %p1744_p1 }
  0x25   : > { %1754 = shalt.err (!%p1751_p6)
}
  0x26   : > { %s1887_s15 = smov 128   ;;  %s1888_s16 = smov 8  }
  0x27   : > { %1488 = dma.hbm_to_vmem [thread:$0]  (!%p1973_p11), %s2177_s1, 2048, %s1966_s28, [#allocation6], %s1887_s15, %s1887_s15, %s1888_s16  }
  0x28   : > { %s1755_s7 = scalar_lea.hbm %s2179_s3, 12288 }
  0x29   : > { %p1756_p2 = scmp.ne.s32.totalorder %s2179_s3, %s1755_s7  ;;  %p1762_p10 = scmp.lt.u32.totalorder %s1755_s7, %s2179_s3 }
  0x2b   : > { %p1758_p1 = pnand %p1756_p2, %p1729_p13 }
  0x2d   : > { %p1759_p6 = pneg %p1758_p1 }
  0x2f   : > { %p1764_p3 = pnand %p1762_p10, %p1759_p6 }
  0x31   : > { %1767 = shalt.err (!%p1764_p3)
}
  0x32   : > { %s1768_s28 = scalar_lea.vmem %s1977_s6, 12288  ;;  %p1776_p12 = scmp.lt.s32.totalorder %s1977_s6, %s1977_s6 }
  0x33   : > { %p1769_p5 = scmp.ne.s32.totalorder %s1977_s6, %s1768_s28  ;;  %p1777_p0 = scmp.lt.s32.totalorder %s1768_s28, %s1768_s28 }
  0x35   : > { %p1771_p7 = pnand %p1769_p5, %p1729_p13  ;;  %p1778_p2 = por %p1777_p0, %p1776_p12 }
  0x37   : > { %p1772_p9 = pneg %p1771_p7 }
  0x39   : > { %p1779_p1 = pnand %p1778_p2, %p1772_p9 }
  0x3b   : > { %1782 = shalt.err (!%p1779_p1)
}
  0x3c   : > { %1491 = dma.hbm_to_vmem [thread:$0]  (!%p1973_p11), %s2179_s3, 12288, %s1977_s6, [#allocation6], %s1887_s15, %s1887_s15, %s1888_s16  }
  0x3d   : > { %s2032_s14 = sadd.s32 1, %s1883_s21   ;;  %s29_s29 = sadd.s32 1, %s1879_s20 }
  0x3e   : > { %s26_s17 = ssub.s32 %s1883_s21, %s2032_s14  ;;  %p36_p13 = scmp.ne.s32.totalorder %s1879_s20, %s1875_s19 }
  0x3f   : > { %p27_p6 = scmp.eq.s32.totalorder %s26_s17, 0  ;;  %p37_p10 = scmp.eq.s32.totalorder %s1883_s21, 0 }
  0x40   : > { %p2189_p3 = scmp.eq.s32.totalorder %s1943_s22, 1  ;;  %p1502_p7 = scmp.lt.s32.totalorder %s1883_s21, 2 }
  0x41   : > { %s2048_s27 = scalar_select %p27_p6, %s1879_s20, %s29_s29  }
  0x42   : > { %p2042_p5 = por %p2189_p3, %p36_p13  ;;  %p38_p9 = por %p37_p10, %p36_p13 }
  0x43   : > { %s208_s30 = sand.u32 1, %s1879_s20   ;;  %s1347_s6 = sshll.u32 %s1883_s21, 7 }
  0x44   : > { %s2190_s23 = scalar_select %p2042_p5, 1, 0 }
  0x45   : > { %s1346_s7 = sshll.u32 %s208_s30, 3  ;;  %s2055_s8 = scalar_lea.hbm %s2176_s0, %s1347_s6 }
  0x46   : > { %s212_s9 = scalar_lea.vmem [#allocation2], %s1346_s7  ;;  %p2059_p11 = pnand %p1502_p7, %p38_p9 }
  0x47   : > { %s219_s10 = sshll.u32 %s212_s9, 4  ;;  %s209_s28 = scalar_lea.sflag [#allocation3], %s208_s30  ;;  %s2057_s10 = int_to_ptr.vmem [resolvable:$true] %s219_s10 }
  0x48   : > { %s1783_s12 = scalar_lea.hbm %s2055_s8, 128  ;;  %p1785_p0 = pneg %p2059_p11 }
  0x49   : > { %p1784_p12 = scmp.ne.s32.totalorder %s2055_s8, %s1783_s12  ;;  %s1788_s17 = scalar_lea.hbm %s2176_s0, 256 }
  0x4a   : > { %p1789_p13 = scmp.lt.u32.totalorder %s2055_s8, %s2176_s0  ;;  %p1790_p6 = scmp.lt.u32.totalorder %s1788_s17, %s1783_s12 }
  0x4b   : > { %p1786_p2 = pnand %p1785_p0, %p1784_p12  ;;  %p1792_p3 = scmp.lt.u32.totalorder %s1783_s12, %s2055_s8 }
  0x4c   : > { %p1791_p10 = por %p1790_p6, %p1789_p13 }
  0x4d   : > { %p1787_p1 = pneg %p1786_p2 }
  0x4e   : > { %p1793_p7 = por %p1792_p3, %p1791_p10 }
  0x50   : > { %p1794_p9 = pnand %p1793_p7, %p1787_p1 }
  0x52   : > { %1797 = shalt.err (!%p1794_p9)
}
  0x53   : > { %s1798_s30 = scalar_lea.vmem %s2057_s10, 128  ;;  %s1889_s15 = smov [#allocation2]  }
  0x54   : > { %p1799_p12 = scmp.ne.s32.totalorder %s2057_s10, %s1798_s30  ;;  %s1803_s16 = sshll.u32 %s1889_s15, 4  ;;  %s1804_s16 = int_to_ptr.vmem [resolvable:$false] %s1803_s16 }
  0x55   : > { %s1805_s9 = scalar_lea.vmem %s1804_s16, 256  ;;  %p1806_p4 = scmp.lt.s32.totalorder %s2057_s10, %s1804_s16 }
  0x56   : > { %p1801_p2 = pnand %p1799_p12, %p1785_p0  ;;  %p1807_p13 = scmp.lt.s32.totalorder %s1805_s9, %s1798_s30 }
  0x58   : > { %p1802_p5 = pneg %p1801_p2  ;;  %p1808_p6 = por %p1807_p13, %p1806_p4 }
  0x5a   : > { %p1809_p10 = pnand %p1808_p6, %p1802_p5 }
  0x5c   : > { %1812 = shalt.err (!%p1809_p10)
}
  0x5d   : > { %1495 = dma.hbm_to_vmem [thread:$0]  (!%p2059_p11), %s2055_s8, 128, %s2057_s10, %s209_s28  }
  0x5e   : > { %228 = sbr.rel (%p1962_p8) target bundleno = 1701 (0x6a5), region = 40  ;;  %s2091_s12 = sand.u32 (!%p1962_p8), 1, %s1875_s19  }
  0x5f   : > { %s1349_s13 = sshll.u32 (!%p1962_p8), %s2091_s12, 3  ;;  %s231_s29 = scalar_lea.sflag (!%p1962_p8), [#allocation3], %s2091_s12 }
  0x60   : > { %s234_s17 = scalar_lea.vmem (!%p1962_p8), [#allocation2], %s1349_s13  ;;  %p2192_p4 = scmp.ne.s32.totalorder (!%p1962_p8), %s2185_s24, 0 }
  0x65   : > { %1858 = dma.done.wait (%p2192_p4), %s231_s29, 128  }
  0x66   : > { %1860 = vsyncadd (%p2192_p4), %s231_s29, 4294967168  ;;  %p2193_p5 = scmp.eq.s32.totalorder %s1943_s22, 0 }
  0x68   : > { %1862 = dma.done.wait (%p2193_p5), [#allocation6], 14336   ;;  %p2194_p11 = pmov %p2193_p5 }
  0x69   : > { %v270_v0 = vld [vmem:[%s234_s17] sm:$0xff]  ;;  %v1543_v2 = vld [vmem:[#allocation5 + $0x4] ss:$8 sps:$4 sm:$0xff]   ;;  %v1545_v3 = vld [vmem:[#allocation5] ss:$8 sps:$4 sm:$0xff]   ;;  %v1890_v17 = vmov 0   ;;  %v303_v45 = vlaneseq }
  0x6a   : > { %1864 = vsyncadd (%p2194_p11), [#allocation6], 4294952960  ;;  %v288_v1 = vmul.f32 %v270_v0, %v270_v0  ;;  %393 = vmatprep.subr.bf16.mxu0 %v1543_v2  ;;  %v1546_v4 = vld [vmem:[#allocation5 + $0x14] ss:$8 sps:$4 sm:$0xff]   ;;  %v1548_v5 = vld [vmem:[#allocation5 + $0x10] ss:$8 sps:$4 sm:$0xff]   ;;  %425 = vmatprep.mubr.bf16.mxu0 %v1890_v17 }
  0x6b   : > { %394 = vmatpush1.bf16.msra.mxu0 %v1545_v3  ;;  %v1549_v6 = vld [vmem:[#allocation5 + $0x24] ss:$8 sps:$4 sm:$0xff]   ;;  %v1551_v7 = vld [vmem:[#allocation5 + $0x20] ss:$8 sps:$4 sm:$0xff]   ;;  %v1552_v8 = vld [vmem:[#allocation5 + $0x34] ss:$8 sps:$4 sm:$0xff]  }
  0x6c   : > { %289 = vadd.xlane.f32.xlu0 %v288_v1  ;;  %395 = vmatprep.subr.bf16.mxu0 %v1546_v4  ;;  %v1554_v9 = vld [vmem:[#allocation5 + $0x30] ss:$8 sps:$4 sm:$0xff]   ;;  %v1555_v10 = vld [vmem:[#allocation5 + $0x44] ss:$8 sps:$4 sm:$0xff]   ;;  %v1557_v11 = vld [vmem:[#allocation5 + $0x40] ss:$8 sps:$4 sm:$0xff]  }
  0x6d   : > { %v1558_v12 = vld [vmem:[#allocation5 + $0x54] ss:$8 sps:$4 sm:$0xff]   ;;  %v1560_v13 = vld [vmem:[#allocation5 + $0x50] ss:$8 sps:$4 sm:$0xff]   ;;  %v1561_v14 = vld [vmem:[#allocation5 + $0x64] ss:$8 sps:$4 sm:$0xff]  }
  0x6e   : > { %v1563_v15 = vld [vmem:[#allocation5 + $0x60] ss:$8 sps:$4 sm:$0xff]   ;;  %v1564_v16 = vld [vmem:[#allocation5 + $0x74] ss:$8 sps:$4 sm:$0xff]   ;;  %v1566_v18 = vld [vmem:[#allocation5 + $0x70] ss:$8 sps:$4 sm:$0xff]  }
  0x6f   : > { %396 = vmatpush1.bf16.msra.mxu0 %v1548_v5  ;;  %v1567_v29 = vld [vmem:[#allocation7 + $0x4] ss:$8 sps:$4 sm:$0xff]   ;;  %v1569_v30 = vld [vmem:[#allocation7] ss:$8 sps:$4 sm:$0xff]   ;;  %v1570_v31 = vld [vmem:[#allocation7 + $0x14] ss:$8 sps:$4 sm:$0xff]  }
  0x70   : > { %397 = vmatprep.subr.bf16.mxu0 %v1549_v6  ;;  %658 = vmatprep.subr.bf16.mxu1 %v1567_v29  ;;  %v1572_v32 = vld [vmem:[#allocation7 + $0x10] ss:$8 sps:$4 sm:$0xff]   ;;  %v1573_v33 = vld [vmem:[#allocation7 + $0x24] ss:$8 sps:$4 sm:$0xff]   ;;  %v1575_v34 = vld [vmem:[#allocation7 + $0x20] ss:$8 sps:$4 sm:$0xff]  }
  0x71   : > { %659 = vmatpush1.bf16.msra.mxu1 %v1569_v30  ;;  %v1576_v35 = vld [vmem:[#allocation7 + $0x34] ss:$8 sps:$4 sm:$0xff]   ;;  %v1578_v36 = vld [vmem:[#allocation7 + $0x30] ss:$8 sps:$4 sm:$0xff]   ;;  %v1579_v37 = vld [vmem:[#allocation7 + $0x44] ss:$8 sps:$4 sm:$0xff]  }
  0x72   : > { %660 = vmatprep.subr.bf16.mxu1 %v1570_v31  ;;  %v1581_v38 = vld [vmem:[#allocation7 + $0x40] ss:$8 sps:$4 sm:$0xff]   ;;  %v1582_v39 = vld [vmem:[#allocation7 + $0x54] ss:$8 sps:$4 sm:$0xff]   ;;  %v1584_v40 = vld [vmem:[#allocation7 + $0x50] ss:$8 sps:$4 sm:$0xff]  }
  0x73   : > { %398 = vmatpush1.bf16.msra.mxu0 %v1551_v7  ;;  %v1585_v41 = vld [vmem:[#allocation7 + $0x64] ss:$8 sps:$4 sm:$0xff]   ;;  %v1587_v42 = vld [vmem:[#allocation7 + $0x60] ss:$8 sps:$4 sm:$0xff]   ;;  %v1588_v43 = vld [vmem:[#allocation7 + $0x74] ss:$8 sps:$4 sm:$0xff]  }
  0x74   : > { %399 = vmatprep.subr.bf16.mxu0 %v1552_v8  ;;  %v1590_v44 = vld [vmem:[#allocation7 + $0x70] ss:$8 sps:$4 sm:$0xff]   ;;  %v304_v46 = vshrl.u32 %v303_v45, 7  ;;  %v1591_v63 = vld [vmem:[#allocation7 + $0x84] ss:$8 sps:$4 sm:$0xff]   ;;  %s1352_s30 = sshll.u32 %s2091_s12, 4 }
  0x75   : > { %661 = vmatpush1.bf16.msra.mxu1 %v1572_v32  ;;  %v287_v48 = vld [vmem:[%s2178_s2] sm:$0x3]  ;;  %v1594_v1 = vld [vmem:[#allocation7 + $0x94] ss:$8 sps:$4 sm:$0xff]   ;;  %v1597_v3 = vld [vmem:[#allocation7 + $0xa4] ss:$8 sps:$4 sm:$0xff]  }
  0x76   : > { %662 = vmatprep.subr.bf16.mxu1 %v1573_v33  ;;  %v2103_v47 = vsub.s32 0, %v304_v46  ;;  %v2108_v49 = vsub.s32 1, %v304_v46  ;;  %v1596_v2 = vld [vmem:[#allocation7 + $0x90] ss:$8 sps:$4 sm:$0xff]   ;;  %v1599_v4 = vld [vmem:[#allocation7 + $0xa0] ss:$8 sps:$4 sm:$0xff]  }
  0x77   : > { %400 = vmatpush1.bf16.msra.mxu0 %v1554_v9  ;;  %v1600_v5 = vld [vmem:[#allocation7 + $0xb4] ss:$8 sps:$4 sm:$0xff]   ;;  %v1602_v6 = vld [vmem:[#allocation7 + $0xb0] ss:$8 sps:$4 sm:$0xff]   ;;  %v1603_v7 = vld [vmem:[#allocation7 + $0xc4] ss:$8 sps:$4 sm:$0xff]  }
  0x78   : > { %401 = vmatprep.subr.bf16.mxu0 %v1555_v10  ;;  %v306_v50 = vrot.slane %v287_v48, %v2103_v47  ;;  %v310_v51 = vrot.slane %v287_v48, %v2108_v49  ;;  %v1605_v8 = vld [vmem:[#allocation7 + $0xc0] ss:$8 sps:$4 sm:$0xff]   ;;  %v1606_v9 = vld [vmem:[#allocation7 + $0xd4] ss:$8 sps:$4 sm:$0xff]   ;;  %v1608_v10 = vld [vmem:[#allocation7 + $0xd0] ss:$8 sps:$4 sm:$0xff]  }
  0x79   : > { %663 = vmatpush1.bf16.msra.mxu1 %v1575_v34  ;;  %v1620_v29 = vld [vmem:[#allocation7 + $0x114] ss:$8 sps:$4 sm:$0xff]   ;;  %v1618_v30 = vld [vmem:[#allocation7 + $0x110] ss:$8 sps:$4 sm:$0xff]   ;;  %v1623_v31 = vld [vmem:[#allocation7 + $0x124] ss:$8 sps:$4 sm:$0xff]  }
  0x7a   : > { %664 = vmatprep.subr.bf16.mxu1 %v1576_v35  ;;  %v1621_v32 = vld [vmem:[#allocation7 + $0x120] ss:$8 sps:$4 sm:$0xff]   ;;  %v1626_v33 = vld [vmem:[#allocation7 + $0x134] ss:$8 sps:$4 sm:$0xff]   ;;  %v1624_v34 = vld [vmem:[#allocation7 + $0x130] ss:$8 sps:$4 sm:$0xff]  }
  0x7b   : > { %402 = vmatpush1.bf16.msra.mxu0 %v1557_v11  ;;  %v1609_v11 = vld [vmem:[#allocation7 + $0xe4] ss:$8 sps:$4 sm:$0xff]   ;;  %s1472_s15 = sshll.u32 %s1943_s22, 8  ;;  %s268_s16 = scalar_lea.vmem [#allocation8], %s1352_s30 }
  0x7c   : > { %403 = vmatprep.subr.bf16.mxu0 %v1558_v12  ;;  %v1611_v12 = vld [vmem:[#allocation7 + $0xe0] ss:$8 sps:$4 sm:$0xff]   ;;  %v1629_v35 = vld [vmem:[#allocation7 + $0x144] ss:$8 sps:$4 sm:$0xff]   ;;  %s1252_s9 = sshll.u32 %s268_s16, 4  ;;  %s2132_s17 = scalar_lea.hbm %s2181_s5, %s1472_s15  ;;  %s2134_s9 = int_to_ptr.vmem [resolvable:$true] %s1252_s9 }
  0x7d   : > { %665 = vmatpush1.bf16.msra.mxu1 %v1578_v36  ;;  %v1627_v36 = vld [vmem:[#allocation7 + $0x140] ss:$8 sps:$4 sm:$0xff]   ;;  %s1238_s22 = scalar_lea.sflag [#allocation4], %s2091_s12  ;;  %s1813_s24 = scalar_lea.vmem %s2134_s9, 256 }
  0x7e   : > { %666 = vmatprep.subr.bf16.mxu1 %v1579_v37  ;;  %v1632_v37 = vld [vmem:[#allocation7 + $0x154] ss:$8 sps:$4 sm:$0xff]   ;;  %p1814_p8 = scmp.ne.s32.totalorder %s2134_s9, %s1813_s24  ;;  %p2195_p0 = scmp.ne.s32.totalorder %s2190_s23, 0 }
  0x7f   : > { %404 = vmatpush1.bf16.msra.mxu0 %v1560_v13  ;;  %v1612_v13 = vld [vmem:[#allocation7 + $0xf4] ss:$8 sps:$4 sm:$0xff]   ;;  %s1891_s26 = smov [#allocation8]  }
  0x80   : > { %405 = vmatprep.subr.bf16.mxu0 %v1561_v14  ;;  %v1614_v14 = vld [vmem:[#allocation7 + $0xf0] ss:$8 sps:$4 sm:$0xff]   ;;  %p1815_p1 = pnand %p1814_p8, %p2195_p0  ;;  %s1817_s8 = sshll.u32 %s1891_s26, 4  ;;  %s1818_s8 = int_to_ptr.vmem [resolvable:$false] %s1817_s8 }
  0x81   : > { %667 = vmatpush1.bf16.msra.mxu1 %v1581_v38  ;;  %v1630_v38 = vld [vmem:[#allocation7 + $0x150] ss:$8 sps:$4 sm:$0xff]   ;;  %s1819_s10 = scalar_lea.vmem %s1818_s8, 512  ;;  %p1820_p7 = scmp.lt.s32.totalorder %s2134_s9, %s1818_s8 }
  0x82   : > { %668 = vmatprep.subr.bf16.mxu1 %v1582_v39  ;;  %v1635_v39 = vld [vmem:[#allocation7 + $0x164] ss:$8 sps:$4 sm:$0xff]   ;;  %p1816_p3 = pneg %p1815_p1  ;;  %p1821_p9 = scmp.lt.s32.totalorder %s1819_s10, %s1813_s24 }
  0x83   : > { %406 = vmatpush1.bf16.msra.mxu0 %v1563_v15 }
  0x84   : > { %407 = vmatprep.subr.bf16.mxu0 %v1564_v16  ;;  %p1822_p12 = por %p1821_p9, %p1820_p7 }
  0x85   : > { %669 = vmatpush1.bf16.msra.mxu1 %v1584_v40  ;;  %v1633_v40 = vld [vmem:[#allocation7 + $0x160] ss:$8 sps:$4 sm:$0xff]  }
  0x86   : > { %670 = vmatprep.subr.bf16.mxu1 %v1585_v41  ;;  %v1638_v41 = vld [vmem:[#allocation7 + $0x174] ss:$8 sps:$4 sm:$0xff]   ;;  %p1823_p2 = pnand %p1822_p12, %p1816_p3 }
  0x87   : > { %408 = vmatpush1.bf16.msra.mxu0 %v1566_v18 }
  0x89   : > { %671 = vmatpush1.bf16.msra.mxu1 %v1587_v42  ;;  %v1636_v42 = vld [vmem:[#allocation7 + $0x170] ss:$8 sps:$4 sm:$0xff]  }
  0x8a   : > { %672 = vmatprep.subr.bf16.mxu1 %v1588_v43  ;;  %v468_v43 = vld [vmem:[%s2180_s4] sm:$0x3] }
  0x8b   : > { %v495_v45 = vrot.slane %v468_v43, %v2108_v49 }
  0x8d   : > { %673 = vmatpush1.bf16.msra.mxu1 %v1590_v44  ;;  %v491_v44 = vrot.slane %v468_v43, %v2103_v47 }
  0x8e   : > { %674 = vmatprep.subr.bf16.mxu1 %v1591_v63  ;;  %v1647_v63 = vld [vmem:[#allocation7 + $0x1a4] ss:$8 sps:$4 sm:$0xff]  }
  0xf9   : > { %v290_v19 = vpop.xlane.xlu0 %289 }
  0xfa   : > { %1711 = vrsqrt.f32 %v290_v19  ;;  %vm293_vm0 = vcmp.eq.f32.partialorder %v290_v19, inf  ;;  %v296_v22 = vand.u32 2147483648, %v290_v19  ;;  %vm295_vm1 = vcmp.eq.f32.partialorder %v290_v19, 0.0 }
 0x104   : > { %v1712_v20 = vpop.eup %1711 }
 0x105   : > { %v292_v21 = vmul.f32 %v1712_v20, %v290_v19 }
 0x107   : > { %v294_v23 = vsel %vm293_vm0, %v290_v19, %v292_v21 }
 0x108   : > { %v297_v24 = vsel %vm295_vm1, %v296_v22, %v294_v23 }
 0x109   : > { %v298_v25 = vadd.f32 1e-08, %v297_v24 }
 0x10b   : > { %1713 = vrcp.f32 %v298_v25 }
 0x115   : > { %v1714_v26 = vpop.eup %1713 }
 0x116   : > { %v300_v27 = vmul.f32 %v1714_v26, %v270_v0  ;;  %v1593_v0 = vld [vmem:[#allocation7 + $0x80] ss:$8 sps:$4 sm:$0xff]  }
 0x117   : > { %675 = vmatpush1.bf16.msra.mxu1 %v1593_v0  ;;  %v1645_v0 = vld [vmem:[#allocation7 + $0x1a0] ss:$8 sps:$4 sm:$0xff]  }
 0x118   : > { %v301_v28 = vpack.c.bf16 %v300_v27, %v300_v27  ;;  %676 = vmatprep.subr.bf16.mxu1 %v1594_v1  ;;  %v1615_v27 = vld [vmem:[#allocation7 + $0x100] ss:$8 sps:$4 sm:$0xff]   ;;  %v1650_v1 = vld [vmem:[#allocation7 + $0x1b4] ss:$8 sps:$4 sm:$0xff]  }
 0x11a   : > { %426 = vmatmul.mubr.bf16.vlgmr.msra.gmra.mrb[0].mxu0 %v301_v28  ;;  %v1617_v28 = vld [vmem:[#allocation7 + $0x104] ss:$8 sps:$4 sm:$0xff]  }
 0x11b   : > { %677 = vmatpush1.bf16.msra.mxu1 %v1596_v2  ;;  %925 = vmatprep.subr.bf16.mxu0 %v1617_v28  ;;  %v1648_v2 = vld [vmem:[#allocation7 + $0x1b0] ss:$8 sps:$4 sm:$0xff]   ;;  %v1669_v28 = vld [vmem:[#allocation7 + $0x220] ss:$8 sps:$4 sm:$0xff]  }
 0x11c   : > { %678 = vmatprep.subr.bf16.mxu1 %v1597_v3  ;;  %926 = vmatpush1.bf16.msra.mxu0 %v1615_v27  ;;  %v1653_v3 = vld [vmem:[#allocation7 + $0x1c4] ss:$8 sps:$4 sm:$0xff]  }
 0x11d   : > { %927 = vmatprep.subr.bf16.mxu0 %v1620_v29  ;;  %v1671_v27 = vld [vmem:[#allocation7 + $0x224] ss:$8 sps:$4 sm:$0xff]   ;;  %v1674_v29 = vld [vmem:[#allocation7 + $0x234] ss:$8 sps:$4 sm:$0xff]  }
 0x11f   : > { %679 = vmatpush1.bf16.msra.mxu1 %v1599_v4  ;;  %v1651_v4 = vld [vmem:[#allocation7 + $0x1c0] ss:$8 sps:$4 sm:$0xff]  }
 0x120   : > { %680 = vmatprep.subr.bf16.mxu1 %v1600_v5  ;;  %928 = vmatpush1.bf16.msra.mxu0 %v1618_v30  ;;  %v1656_v5 = vld [vmem:[#allocation7 + $0x1d4] ss:$8 sps:$4 sm:$0xff]   ;;  %v1672_v30 = vld [vmem:[#allocation7 + $0x230] ss:$8 sps:$4 sm:$0xff]  }
 0x121   : > { %929 = vmatprep.subr.bf16.mxu0 %v1623_v31  ;;  %v1677_v31 = vld [vmem:[#allocation7 + $0x244] ss:$8 sps:$4 sm:$0xff]  }
 0x123   : > { %681 = vmatpush1.bf16.msra.mxu1 %v1602_v6  ;;  %v1654_v6 = vld [vmem:[#allocation7 + $0x1d0] ss:$8 sps:$4 sm:$0xff]  }
 0x124   : > { %682 = vmatprep.subr.bf16.mxu1 %v1603_v7  ;;  %930 = vmatpush1.bf16.msra.mxu0 %v1621_v32  ;;  %v1659_v7 = vld [vmem:[#allocation7 + $0x1e4] ss:$8 sps:$4 sm:$0xff]   ;;  %v1675_v32 = vld [vmem:[#allocation7 + $0x240] ss:$8 sps:$4 sm:$0xff]  }
 0x125   : > { %931 = vmatprep.subr.bf16.mxu0 %v1626_v33  ;;  %v1680_v33 = vld [vmem:[#allocation7 + $0x254] ss:$8 sps:$4 sm:$0xff]  }
 0x127   : > { %683 = vmatpush1.bf16.msra.mxu1 %v1605_v8  ;;  %v1657_v8 = vld [vmem:[#allocation7 + $0x1e0] ss:$8 sps:$4 sm:$0xff]  }
 0x128   : > { %684 = vmatprep.subr.bf16.mxu1 %v1606_v9  ;;  %932 = vmatpush1.bf16.msra.mxu0 %v1624_v34  ;;  %v1662_v9 = vld [vmem:[#allocation7 + $0x1f4] ss:$8 sps:$4 sm:$0xff]   ;;  %v1678_v34 = vld [vmem:[#allocation7 + $0x250] ss:$8 sps:$4 sm:$0xff]  }
 0x129   : > { %933 = vmatprep.subr.bf16.mxu0 %v1629_v35  ;;  %v1683_v35 = vld [vmem:[#allocation7 + $0x264] ss:$8 sps:$4 sm:$0xff]  }
 0x12b   : > { %685 = vmatpush1.bf16.msra.mxu1 %v1608_v10  ;;  %v1660_v10 = vld [vmem:[#allocation7 + $0x1f0] ss:$8 sps:$4 sm:$0xff]  }
 0x12c   : > { %686 = vmatprep.subr.bf16.mxu1 %v1609_v11  ;;  %934 = vmatpush1.bf16.msra.mxu0 %v1627_v36  ;;  %v1681_v36 = vld [vmem:[#allocation7 + $0x260] ss:$8 sps:$4 sm:$0xff]  }
 0x12d   : > { %935 = vmatprep.subr.bf16.mxu0 %v1632_v37  ;;  %v1686_v37 = vld [vmem:[#allocation7 + $0x274] ss:$8 sps:$4 sm:$0xff]  }
 0x12f   : > { %687 = vmatpush1.bf16.msra.mxu1 %v1611_v12 }
 0x130   : > { %688 = vmatprep.subr.bf16.mxu1 %v1612_v13  ;;  %936 = vmatpush1.bf16.msra.mxu0 %v1630_v38  ;;  %v1684_v38 = vld [vmem:[#allocation7 + $0x270] ss:$8 sps:$4 sm:$0xff]  }
 0x131   : > { %937 = vmatprep.subr.bf16.mxu0 %v1635_v39  ;;  %v1401_v39 = vld [vmem:[%s2180_s4 + $0x2] sm:$0x3] }
 0x133   : > { %689 = vmatpush1.bf16.msra.mxu1 %v1614_v14 }
 0x134   : > { %938 = vmatpush1.bf16.msra.mxu0 %v1633_v40  ;;  %v758_v40 = vrot.slane %v1401_v39, %v2103_v47 }
 0x135   : > { %939 = vmatprep.subr.bf16.mxu0 %v1638_v41  ;;  %v762_v41 = vrot.slane %v1401_v39, %v2108_v49 }
 0x138   : > { %940 = vmatpush1.bf16.msra.mxu0 %v1636_v42 }
 0x1ed   : > { %v427_v52 = vpop.f32.mrb[0].mxu0 }
 0x1ee   : > { %v428_v53 = vadd.f32 %v427_v52, %v306_v50  ;;  %v429_v54 = vpop.f32.mrb[1].mxu0 }
 0x1ef   : > { %v430_v55 = vadd.f32 %v429_v54, %v310_v51  ;;  %v431_v56 = vpop.f32.mrb[2].mxu0 }
 0x1f0   : > { %v434_v57 = vmax.f32 %v428_v53, 0.0  ;;  %v432_v58 = vpop.f32.mrb[3].mxu0 }
 0x1f1   : > { %v435_v59 = vmax.f32 %v430_v55, 0.0 }
 0x1f2   : > { %v469_v60 = vmul.f32 %v434_v57, %v434_v57 }
 0x1f3   : > { %v470_v61 = vmul.f32 %v435_v59, %v435_v59 }
 0x1f5   : > { %v471_v62 = vadd.f32 %v470_v61, %v469_v60  ;;  %v1639_v60 = vld [vmem:[#allocation7 + $0x180] ss:$8 sps:$4 sm:$0xff]   ;;  %v1644_v61 = vld [vmem:[#allocation7 + $0x194] ss:$8 sps:$4 sm:$0xff]  }
 0x1f7   : > { %472 = vadd.xlane.f32.xlu0 %v471_v62  ;;  %v1642_v62 = vld [vmem:[#allocation7 + $0x190] ss:$8 sps:$4 sm:$0xff]  }
 0x284   : > { %v473_v15 = vpop.xlane.xlu0 %472 }
 0x285   : > { %1715 = vrsqrt.f32 %v473_v15  ;;  %vm476_vm2 = vcmp.eq.f32.partialorder %v473_v15, inf  ;;  %v479_v18 = vand.u32 2147483648, %v473_v15  ;;  %vm478_vm3 = vcmp.eq.f32.partialorder %v473_v15, 0.0 }
 0x28f   : > { %v1716_v16 = vpop.eup %1715 }
 0x290   : > { %v475_v17 = vmul.f32 %v1716_v16, %v473_v15 }
 0x292   : > { %v477_v19 = vsel %vm476_vm2, %v473_v15, %v475_v17 }
 0x293   : > { %v480_v20 = vsel %vm478_vm3, %v479_v18, %v477_v19 }
 0x294   : > { %v481_v21 = vadd.f32 1e-08, %v480_v20 }
 0x296   : > { %1717 = vrcp.f32 %v481_v21 }
 0x2a0   : > { %v1718_v22 = vpop.eup %1717 }
 0x2a1   : > { %v484_v23 = vmul.f32 %v1718_v22, %v435_v59  ;;  %v483_v24 = vmul.f32 %v1718_v22, %v434_v57  ;;  %v1641_v59 = vld [vmem:[#allocation7 + $0x184] ss:$8 sps:$4 sm:$0xff]  }
 0x2a2   : > { %941 = vmatprep.subr.bf16.mxu0 %v1641_v59  ;;  %v1695_v59 = vld [vmem:[#allocation7 + $0x2a4] ss:$8 sps:$4 sm:$0xff]  }
 0x2a3   : > { %v486_v25 = vpack.c.bf16 %v484_v23, %v484_v23  ;;  %v485_v26 = vpack.c.bf16 %v483_v24, %v483_v24  ;;  %942 = vmatpush1.bf16.msra.mxu0 %v1639_v60  ;;  %v1663_v23 = vld [vmem:[#allocation7 + $0x200] ss:$8 sps:$4 sm:$0xff]   ;;  %v1665_v24 = vld [vmem:[#allocation7 + $0x204] ss:$8 sps:$4 sm:$0xff]  }
 0x2a4   : > { %943 = vmatprep.subr.bf16.mxu0 %v1644_v61  ;;  %1192 = vmatprep.subr.bf16.mxu1 %v1665_v24  ;;  %v1693_v60 = vld [vmem:[#allocation7 + $0x2a0] ss:$8 sps:$4 sm:$0xff]   ;;  %v1698_v61 = vld [vmem:[#allocation7 + $0x2b4] ss:$8 sps:$4 sm:$0xff]  }
 0x2a5   : > { %690 = vmatprep.mubr.bf16.mxu1 %v486_v25  ;;  %v1668_v25 = vld [vmem:[#allocation7 + $0x214] ss:$8 sps:$4 sm:$0xff]  }
 0x2a6   : > { %691 = vmatmul.mubr.bf16.vlgmr.msra.gmra.mrb[0].mxu1 %v485_v26  ;;  %v1666_v26 = vld [vmem:[#allocation7 + $0x210] ss:$8 sps:$4 sm:$0xff]  }
 0x2a7   : > { %944 = vmatpush1.bf16.msra.mxu0 %v1642_v62  ;;  %1193 = vmatpush1.bf16.msra.mxu1 %v1663_v23  ;;  %v1696_v62 = vld [vmem:[#allocation7 + $0x2b0] ss:$8 sps:$4 sm:$0xff]  }
 0x2a8   : > { %945 = vmatprep.subr.bf16.mxu0 %v1647_v63  ;;  %1194 = vmatprep.subr.bf16.mxu1 %v1668_v25  ;;  %v1701_v63 = vld [vmem:[#allocation7 + $0x2c4] ss:$8 sps:$4 sm:$0xff]  }
 0x2ab   : > { %946 = vmatpush1.bf16.msra.mxu0 %v1645_v0  ;;  %1195 = vmatpush1.bf16.msra.mxu1 %v1666_v26  ;;  %v1699_v0 = vld [vmem:[#allocation7 + $0x2c0] ss:$8 sps:$4 sm:$0xff]  }
 0x2ac   : > { %947 = vmatprep.subr.bf16.mxu0 %v1650_v1  ;;  %1196 = vmatprep.subr.bf16.mxu1 %v1671_v27  ;;  %v1704_v1 = vld [vmem:[#allocation7 + $0x2d4] ss:$8 sps:$4 sm:$0xff]  }
 0x2af   : > { %948 = vmatpush1.bf16.msra.mxu0 %v1648_v2  ;;  %1197 = vmatpush1.bf16.msra.mxu1 %v1669_v28  ;;  %v1702_v2 = vld [vmem:[#allocation7 + $0x2d0] ss:$8 sps:$4 sm:$0xff]  }
 0x2b0   : > { %949 = vmatprep.subr.bf16.mxu0 %v1653_v3  ;;  %1198 = vmatprep.subr.bf16.mxu1 %v1674_v29  ;;  %v1707_v3 = vld [vmem:[#allocation7 + $0x2e4] ss:$8 sps:$4 sm:$0xff]  }
 0x2b3   : > { %950 = vmatpush1.bf16.msra.mxu0 %v1651_v4  ;;  %1199 = vmatpush1.bf16.msra.mxu1 %v1672_v30  ;;  %v1705_v4 = vld [vmem:[#allocation7 + $0x2e0] ss:$8 sps:$4 sm:$0xff]  }
 0x2b4   : > { %951 = vmatprep.subr.bf16.mxu0 %v1656_v5  ;;  %1200 = vmatprep.subr.bf16.mxu1 %v1677_v31  ;;  %v1710_v5 = vld [vmem:[#allocation7 + $0x2f4] ss:$8 sps:$4 sm:$0xff]  }
 0x2b7   : > { %952 = vmatpush1.bf16.msra.mxu0 %v1654_v6  ;;  %1201 = vmatpush1.bf16.msra.mxu1 %v1675_v32  ;;  %v1708_v6 = vld [vmem:[#allocation7 + $0x2f0] ss:$8 sps:$4 sm:$0xff]  }
 0x2b8   : > { %953 = vmatprep.subr.bf16.mxu0 %v1659_v7  ;;  %1202 = vmatprep.subr.bf16.mxu1 %v1680_v33 }
 0x2bb   : > { %954 = vmatpush1.bf16.msra.mxu0 %v1657_v8  ;;  %1203 = vmatpush1.bf16.msra.mxu1 %v1678_v34 }
 0x2bc   : > { %955 = vmatprep.subr.bf16.mxu0 %v1662_v9  ;;  %1204 = vmatprep.subr.bf16.mxu1 %v1683_v35 }
 0x2bf   : > { %956 = vmatpush1.bf16.msra.mxu0 %v1660_v10  ;;  %1205 = vmatpush1.bf16.msra.mxu1 %v1681_v36 }
 0x2c0   : > { %1206 = vmatprep.subr.bf16.mxu1 %v1686_v37 }
 0x2c3   : > { %1207 = vmatpush1.bf16.msra.mxu1 %v1684_v38 }
 0x379   : > { %v692_v46 = vpop.f32.mrb[0].mxu1 }
 0x37a   : > { %v693_v48 = vadd.f32 %v692_v46, %v491_v44  ;;  %v694_v50 = vpop.f32.mrb[1].mxu1 }
 0x37b   : > { %v695_v51 = vadd.f32 %v694_v50, %v495_v45  ;;  %v696_v52 = vpop.f32.mrb[2].mxu1 }
 0x37c   : > { %v699_v53 = vmax.f32 %v693_v48, 0.0  ;;  %v697_v54 = vpop.f32.mrb[3].mxu1 }
 0x37d   : > { %v700_v55 = vmax.f32 %v695_v51, 0.0 }
 0x37e   : > { %v736_v56 = vmul.f32 %v699_v53, %v699_v53 }
 0x37f   : > { %v737_v57 = vmul.f32 %v700_v55, %v700_v55 }
 0x381   : > { %v738_v58 = vadd.f32 %v737_v57, %v736_v56  ;;  %v1687_v56 = vld [vmem:[#allocation7 + $0x280] ss:$8 sps:$4 sm:$0xff]   ;;  %v1692_v57 = vld [vmem:[#allocation7 + $0x294] ss:$8 sps:$4 sm:$0xff]  }
 0x383   : > { %739 = vadd.xlane.f32.xlu1 %v738_v58  ;;  %v1690_v58 = vld [vmem:[#allocation7 + $0x290] ss:$8 sps:$4 sm:$0xff]  }
 0x410   : > { %v740_v11 = vpop.xlane.xlu1 %739 }
 0x411   : > { %1719 = vrsqrt.f32 %v740_v11  ;;  %vm743_vm4 = vcmp.eq.f32.partialorder %v740_v11, inf  ;;  %v746_v14 = vand.u32 2147483648, %v740_v11  ;;  %vm745_vm5 = vcmp.eq.f32.partialorder %v740_v11, 0.0 }
 0x41b   : > { %v1720_v12 = vpop.eup %1719 }
 0x41c   : > { %v742_v13 = vmul.f32 %v1720_v12, %v740_v11 }
 0x41e   : > { %v744_v15 = vsel %vm743_vm4, %v740_v11, %v742_v13 }
 0x41f   : > { %v747_v16 = vsel %vm745_vm5, %v746_v14, %v744_v15 }
 0x420   : > { %v748_v17 = vadd.f32 1e-08, %v747_v16 }
 0x422   : > { %1721 = vrcp.f32 %v748_v17 }
 0x42c   : > { %v1722_v18 = vpop.eup %1721 }
 0x42d   : > { %v751_v19 = vmul.f32 %v1722_v18, %v700_v55  ;;  %v750_v20 = vmul.f32 %v1722_v18, %v699_v53  ;;  %v1689_v55 = vld [vmem:[#allocation7 + $0x284] ss:$8 sps:$4 sm:$0xff]  }
 0x42e   : > { %1208 = vmatprep.subr.bf16.mxu1 %v1689_v55 }
 0x42f   : > { %v753_v21 = vpack.c.bf16 %v751_v19, %v751_v19  ;;  %v752_v22 = vpack.c.bf16 %v750_v20, %v750_v20  ;;  %1209 = vmatpush1.bf16.msra.mxu1 %v1687_v56  ;;  %v1434_v19 = vld [vmem:[%s2180_s4 + $0x4] sm:$0x3] }
 0x430   : > { %1210 = vmatprep.subr.bf16.mxu1 %v1692_v57  ;;  %v1025_v20 = vrot.slane %v1434_v19, %v2103_v47 }
 0x431   : > { %957 = vmatprep.mubr.bf16.mxu0 %v753_v21  ;;  %v1029_v21 = vrot.slane %v1434_v19, %v2108_v49 }
 0x432   : > { %958 = vmatmul.mubr.bf16.vlgmr.msra.gmra.mrb[4].mxu0 %v752_v22 }
 0x433   : > { %1211 = vmatpush1.bf16.msra.mxu1 %v1690_v58 }
 0x434   : > { %1212 = vmatprep.subr.bf16.mxu1 %v1695_v59 }
 0x437   : > { %1213 = vmatpush1.bf16.msra.mxu1 %v1693_v60 }
 0x438   : > { %1214 = vmatprep.subr.bf16.mxu1 %v1698_v61 }
 0x43b   : > { %1215 = vmatpush1.bf16.msra.mxu1 %v1696_v62 }
 0x43c   : > { %1216 = vmatprep.subr.bf16.mxu1 %v1701_v63 }
 0x43f   : > { %1217 = vmatpush1.bf16.msra.mxu1 %v1699_v0 }
 0x440   : > { %1218 = vmatprep.subr.bf16.mxu1 %v1704_v1 }
 0x443   : > { %1219 = vmatpush1.bf16.msra.mxu1 %v1702_v2 }
 0x444   : > { %1220 = vmatprep.subr.bf16.mxu1 %v1707_v3 }
 0x447   : > { %1221 = vmatpush1.bf16.msra.mxu1 %v1705_v4 }
 0x448   : > { %1222 = vmatprep.subr.bf16.mxu1 %v1710_v5 }
 0x44b   : > { %1223 = vmatpush1.bf16.msra.mxu1 %v1708_v6 }
 0x505   : > { %v959_v42 = vpop.f32.mrb[4].mxu0 }
 0x506   : > { %v960_v43 = vadd.f32 %v959_v42, %v758_v40  ;;  %v961_v44 = vpop.f32.mrb[5].mxu0 }
 0x507   : > { %v962_v45 = vadd.f32 %v961_v44, %v762_v41  ;;  %v963_v46 = vpop.f32.mrb[6].mxu0 }
 0x508   : > { %v966_v48 = vmax.f32 %v960_v43, 0.0  ;;  %v964_v50 = vpop.f32.mrb[7].mxu0 }
 0x509   : > { %v967_v51 = vmax.f32 %v962_v45, 0.0 }
 0x50a   : > { %v1003_v52 = vmul.f32 %v966_v48, %v966_v48 }
 0x50b   : > { %v1004_v53 = vmul.f32 %v967_v51, %v967_v51 }
 0x50d   : > { %v1005_v54 = vadd.f32 %v1004_v53, %v1003_v52 }
 0x50f   : > { %1006 = vadd.xlane.f32.xlu1 %v1005_v54 }
 0x59c   : > { %v1007_v7 = vpop.xlane.xlu1 %1006 }
 0x59d   : > { %1723 = vrsqrt.f32 %v1007_v7  ;;  %vm1010_vm6 = vcmp.eq.f32.partialorder %v1007_v7, inf  ;;  %v1013_v10 = vand.u32 2147483648, %v1007_v7  ;;  %vm1012_vm7 = vcmp.eq.f32.partialorder %v1007_v7, 0.0 }
 0x5a7   : > { %v1724_v8 = vpop.eup %1723 }
 0x5a8   : > { %v1009_v9 = vmul.f32 %v1724_v8, %v1007_v7 }
 0x5aa   : > { %v1011_v11 = vsel %vm1010_vm6, %v1007_v7, %v1009_v9 }
 0x5ab   : > { %v1014_v12 = vsel %vm1012_vm7, %v1013_v10, %v1011_v11 }
 0x5ac   : > { %v1015_v13 = vadd.f32 1e-08, %v1014_v12 }
 0x5ae   : > { %1725 = vrcp.f32 %v1015_v13 }
 0x5b8   : > { %v1726_v14 = vpop.eup %1725 }
 0x5b9   : > { %v1018_v15 = vmul.f32 %v1726_v14, %v967_v51  ;;  %v1017_v16 = vmul.f32 %v1726_v14, %v966_v48 }
 0x5bb   : > { %v1020_v17 = vpack.c.bf16 %v1018_v15, %v1018_v15  ;;  %v1019_v18 = vpack.c.bf16 %v1017_v16, %v1017_v16 }
 0x5bd   : > { %1224 = vmatprep.mubr.bf16.mxu1 %v1020_v17 }
 0x5be   : > { %1225 = vmatmul.mubr.bf16.vlgmr.msra.gmra.mrb[4].mxu1 %v1019_v18 }
 0x691   : > { %v1226_v22 = vpop.f32.mrb[4].mxu1 }
 0x692   : > { %v1227_v23 = vadd.f32 %v1226_v22, %v1025_v20  ;;  %v1228_v24 = vpop.f32.mrb[5].mxu1 }
 0x693   : > { %v1229_v25 = vadd.f32 %v1228_v24, %v1029_v21  ;;  %v1230_v26 = vpop.f32.mrb[6].mxu1 }
 0x694   : > { %v1233_v27 = vmax.f32 %v1227_v23, 0.0  ;;  %v1231_v28 = vpop.f32.mrb[7].mxu1 }
 0x695   : > { %v1234_v29 = vmax.f32 %v1229_v25, 0.0 }
 0x696   : > { %1235 = vst [vmem:[%s268_s16] sm:$0xff] %v1233_v27 }
 0x697   : > { %1236 = vst [vmem:[%s268_s16 + $0x8] sm:$0xff] %v1234_v29 }
 0x698   : > { %1826 = shalt.err (!%p1823_p2)
}
 0x699   : > { %s1827_s12 = scalar_lea.hbm %s2132_s17, 256  ;;  %s1831_s7 = scalar_lea.hbm %s2181_s5, 512 }
 0x69a   : > { %p1828_p13 = scmp.ne.s32.totalorder %s2132_s17, %s1827_s12  ;;  %p1832_p4 = scmp.lt.u32.totalorder %s2132_s17, %s2181_s5 }
 0x69b   : > { %p1833_p5 = scmp.lt.u32.totalorder %s1831_s7, %s1827_s12  ;;  %p1835_p8 = scmp.lt.u32.totalorder %s1827_s12, %s2132_s17 }
 0x69c   : > { %p1829_p6 = pnand %p1828_p13, %p2195_p0 }
 0x69d   : > { %p1834_p11 = por %p1833_p5, %p1832_p4 }
 0x69e   : > { %p1830_p10 = pneg %p1829_p6 }
 0x69f   : > { %p1836_p1 = por %p1835_p8, %p1834_p11 }
 0x6a1   : > { %p1837_p3 = pnand %p1836_p1, %p1830_p10 }
 0x6a3   : > { %1840 = shalt.err (!%p1837_p3)
}
 0x6a4   : > { %1483 = dma.vmem_to_hbm [thread:$0]  (%p2195_p0), %s2134_s9, 256, %s2132_s17, %s1238_s22  }
 0x6a5 PF: > { %s1264_s15 = sand.u32 1, %s1871_s18   ;;  %p2196_p7 = scmp.ne.s32.totalorder %s2186_s25, 0 }
 0x6a6   : > { %p2197_p9 = scmp.ge.s32.totalorder %s1883_s21, 2  ;;  %s1265_s16 = scalar_lea.sflag [#allocation4], %s1264_s15 }
 0x6a8   : > { %p1497_p12 = pnand %p2197_p9, %p2196_p7 }
 0x6aa   : > { %1866 = dma.done.wait (!%p1497_p12), %s1265_s16, 256  }
 0x6ab   : > { %1868 = vsyncadd (!%p1497_p12), %s1265_s16, 4294967040  ;;  %p19_p2 = scmp.ge.s32.totalorder %s2032_s14, 4   ;;  %s2198_s18 = smov %s1875_s19 }
 0x6ac   : > { %s2199_s19 = smov %s1879_s20  ;;  %s2200_s20 = smov %s2048_s27 }
 0x6ad   : > { %s2201_s21 = smov %s2032_s14  ;;  %21 = sbr.rel (!%p19_p2) target bundleno = 6 (0x6), region = 97 }
 0x6b4   :  { %1270 = vsyncpa [#allocation3], 1 }
 0x6b5   :  { %1272 = vsyncpa [#allocation3 + $0x1], 1 }
 0x6b6   :  { %1273 = vsyncpa [#allocation6], 1 }
 0x6b7   :  { %1274 = vsyncpa [#allocation4], 1 }
 0x6b8   :  { %1276 = vsyncpa [#allocation4 + $0x1], 1 }

</bundles_post_ra>
